<compile_context>
chip_gen: v7x
topology: tpu7x:2x2x1
jax: 0.10.0
libtpu: 0.0.40
codegen_flags: <defaults>
</compile_context>

<pallas_src>
import functools

import jax
import jax.numpy as jnp
from jax.experimental import pallas as pl
from jax.experimental.pallas import tpu as pltpu

_BN_EPS = 1e-5
_CARDINALITY = 32
_BASE_WIDTH = 4
_EXPANSION = 4

_TM_CANDS = (1024, 512, 256, 128, 64, 32, 16, 8)
_TN_CANDS = (512, 256, 128)
_TK_CANDS = (512, 256, 128)
_TR_CANDS = (1024, 512, 256, 128, 64, 32, 16, 8)

_W_RESIDENT_BYTES = 6 * 1024 * 1024      # keep the whole weight in VMEM below this


def _detect_vmem_limit():
    # Per-generation VMEM budget: v5e/v6e have 128 MiB per core, v7x only 64 MiB.
    try:
        cap = int(pltpu.get_tpu_info().vmem_capacity_bytes)
    except Exception:
        cap = 64 * 1024 * 1024
    if cap >= 100 * 1024 * 1024:
        return 96 * 1024 * 1024
    return 44 * 1024 * 1024


_VMEM_LIMIT = _detect_vmem_limit()
_VMEM_BUDGET = int(_VMEM_LIMIT * 0.55)


def _round_up(x, m):
    return (x + m - 1) // m * m


def _pick_div(n, candidates):
    for c in candidates:
        if n % c == 0:
            return c
    return candidates[-1]


def _cparams(*semantics):
    return pltpu.CompilerParams(dimension_semantics=semantics,
                                vmem_limit_bytes=_VMEM_LIMIT)


def _mm_vmem_bytes(tm, tk, tn, in_isz, out_isz):
    return (tm * tn * 4                    # f32 accumulator
            + 2 * tm * tk * in_isz         # A double-buffer
            + 2 * tk * tn * in_isz         # B double-buffer
            + 2 * tm * tn * out_isz        # out double-buffer
            + 4 * 2 * tn * 4)              # stats


def _pick_tm(Mp, tk, tn, in_isz, out_isz):
    cands = [c for c in _TM_CANDS
             if Mp % c == 0 and _mm_vmem_bytes(c, tk, tn, in_isz, out_isz) <= _VMEM_BUDGET]
    if not cands:
        return 8
    for c in cands:                        # prefer >=2 row tiles (v7x dual TensorCore)
        if Mp // c >= 2:
            return c
    return cands[0]


def _pick_rows(Mp, C, nstreams):
    for c in _TR_CANDS:
        if Mp % c == 0 and nstreams * 2 * c * max(C, 128) * 2 <= _VMEM_BUDGET:
            return c
    return 8


# ----------------------------- Pallas kernels ------------------------------

def _matmul_bn_kernel(a_ref, b_ref, o_ref, stats_ref, acc_ref):
    """Tiled matmul with BN-statistic epilogue (per-M-tile column sum / sumsq)."""
    k = pl.program_id(2)

    @pl.when(k == 0)
    def _():
        acc_ref[...] = jnp.zeros_like(acc_ref)

    acc_ref[...] += jnp.dot(a_ref[...], b_ref[...],
                            preferred_element_type=jnp.float32)

    @pl.when(k == pl.num_programs(2) - 1)
    def _():
        acc = acc_ref[...]
        o_ref[...] = acc.astype(o_ref.dtype)
        s = jnp.sum(acc, axis=0, keepdims=True)
        ss = jnp.sum(acc * acc, axis=0, keepdims=True)
        stats_ref[...] = jnp.concatenate([s, ss], axis=0)[None]


def _matmul_kernel(a_ref, b_ref, o_ref, acc_ref):
    """Plain tiled matmul (FC head: no BN-stats epilogue)."""
    k = pl.program_id(2)

    @pl.when(k == 0)
    def _():
        acc_ref[...] = jnp.zeros_like(acc_ref)

    acc_ref[...] += jnp.dot(a_ref[...], b_ref[...],
                            preferred_element_type=jnp.float32)

    @pl.when(k == pl.num_programs(2) - 1)
    def _():
        o_ref[...] = acc_ref[...].astype(o_ref.dtype)


def _scale_shift_kernel(x_ref, s_ref, b_ref, o_ref, *, relu):
    y = x_ref[...].astype(jnp.float32) * s_ref[...] + b_ref[...]
    if relu:
        y = jnp.maximum(y, 0.0)
    o_ref[...] = y.astype(o_ref.dtype)


def _scale_shift_add_relu_kernel(x_ref, s_ref, b_ref, r_ref, o_ref):
    y = (x_ref[...].astype(jnp.float32) * s_ref[...] + b_ref[...]
         + r_ref[...].astype(jnp.float32))
    o_ref[...] = jnp.maximum(y, 0.0).astype(o_ref.dtype)


def _tap_reduce_kernel(*refs, ntap, op):
    """Elementwise max/mean over `ntap` shifted-window views (no stacked copy)."""
    o_ref = refs[ntap]
    if op == "max":
        acc = refs[0][...]
        for t in range(1, ntap):
            acc = jnp.maximum(acc, refs[t][...])
        o_ref[...] = acc
    else:
        acc = refs[0][...].astype(jnp.float32)
        for t in range(1, ntap):
            acc = acc + refs[t][...].astype(jnp.float32)
        o_ref[...] = (acc * (1.0 / ntap)).astype(o_ref.dtype)


def _gap_kernel(x_ref, o_ref):
    o_ref[...] = jnp.mean(x_ref[...].astype(jnp.float32), axis=1)


# -------------------------- pallas_call wrappers ----------------------------

@functools.partial(jax.jit, static_argnames=("out_dtype", "with_stats"))
def _dense_matmul(a, b, out_dtype=jnp.bfloat16, with_stats=True):
    """C = A @ B (f32 accumulation); weight kept VMEM-resident when it fits.

    `b` must be pre-padded: rows (Kp) a multiple of 8, cols (Np) a multiple of 128.
    """
    M, K = a.shape
    Kp, Np = b.shape
    Mp = _round_up(M, 8)
    in_isz = a.dtype.itemsize
    out_isz = jnp.dtype(out_dtype).itemsize

    if Kp * Np * in_isz <= _W_RESIDENT_BYTES:
        tk, tn = Kp, Np                            # whole weight resident, gj=gk=1
    else:
        tn = _pick_div(Np, _TN_CANDS)
        tk = _pick_div(Kp, _TK_CANDS) if Kp % 128 == 0 else Kp
    tm = _pick_tm(Mp, tk, tn, in_isz, out_isz)
    gi, gj, gk = Mp // tm, Np // tn, Kp // tk

    if (Mp, Kp) != (M, K):
        a = jnp.pad(a, ((0, Mp - M), (0, Kp - K)))

    cost = pl.CostEstimate(
        flops=2 * Mp * Np * Kp, transcendentals=0,
        bytes_accessed=in_isz * (Mp * Kp + Kp * Np) + out_isz * Mp * Np + gi * 2 * Np * 4)

    if with_stats:
        out, stats = pl.pallas_call(
            _matmul_bn_kernel,
            out_shape=(jax.ShapeDtypeStruct((Mp, Np), out_dtype),
                       jax.ShapeDtypeStruct((gi, 2, Np), jnp.float32)),
            grid=(gi, gj, gk),
            in_specs=[pl.BlockSpec((tm, tk), lambda i, j, k: (i, k)),
                      pl.BlockSpec((tk, tn), lambda i, j, k: (k, j))],
            out_specs=(pl.BlockSpec((tm, tn), lambda i, j, k: (i, j)),
                       pl.BlockSpec((1, 2, tn), lambda i, j, k: (i, 0, j))),
            scratch_shapes=[pltpu.VMEM((tm, tn), jnp.float32)],
            compiler_params=_cparams("parallel", "parallel", "arbitrary"),
            cost_estimate=cost,
        )(a, b)
        return out, stats

    out = pl.pallas_call(
        _matmul_kernel,
        out_shape=jax.ShapeDtypeStruct((Mp, Np), out_dtype),
        grid=(gi, gj, gk),
        in_specs=[pl.BlockSpec((tm, tk), lambda i, j, k: (i, k)),
                  pl.BlockSpec((tk, tn), lambda i, j, k: (k, j))],
        out_specs=pl.BlockSpec((tm, tn), lambda i, j, k: (i, j)),
        scratch_shapes=[pltpu.VMEM((tm, tn), jnp.float32)],
        compiler_params=_cparams("parallel", "parallel", "arbitrary"),
        cost_estimate=cost,
    )(a, b)
    return out, None


@jax.jit
def _grouped_matmul_stats(a, b_banded):
    """Banded block-diagonal matmul for grouped 3x3 convs (+ BN stats).

    a: (M, 9*width) bf16 im2col with tap-major columns (tap, channel).
    b_banded: (nb*9*128, 128) bf16; band j holds the 9 per-tap (128,128)
      block-diagonal weight blocks of output channels [j*128, (j+1)*128).
    Only the diagonal band is multiplied per output tile (no zero-block FLOPs).
    """
    M, K = a.shape
    tn = b_banded.shape[1]                # 128
    width = K // 9
    nb = width // tn
    Mp = _round_up(M, 8)
    tm = _pick_tm(Mp, tn, tn, 2, 2)
    gi = Mp // tm
    if Mp != M:
        a = jnp.pad(a, ((0, Mp - M), (0, 0)))

    out, stats = pl.pallas_call(
        _matmul_bn_kernel,
        out_shape=(jax.ShapeDtypeStruct((Mp, width), jnp.bfloat16),
                   jax.ShapeDtypeStruct((gi, 2, width), jnp.float32)),
        grid=(gi, nb, 9),
        in_specs=[pl.BlockSpec((tm, tn), lambda i, j, k: (i, k * nb + j)),
                  pl.BlockSpec((tn, tn), lambda i, j, k: (j * 9 + k, 0))],
        out_specs=(pl.BlockSpec((tm, tn), lambda i, j, k: (i, j)),
                   pl.BlockSpec((1, 2, tn), lambda i, j, k: (i, 0, j))),
        scratch_shapes=[pltpu.VMEM((tm, tn), jnp.float32)],
        compiler_params=_cparams("parallel", "parallel", "arbitrary"),
        cost_estimate=pl.CostEstimate(
            flops=2 * Mp * 9 * tn * width, transcendentals=0,
            bytes_accessed=2 * (Mp * K + b_banded.size + Mp * width) + gi * 2 * width * 4),
    )(a, b_banded)
    return out, stats


@jax.jit
def _bn_coeffs(stats, gamma, beta, m):
    """Finalize BN batch statistics (single-pass sum/sumsq) into scale/shift."""
    c = gamma.shape[0]
    s = jnp.sum(stats[:, 0, :c], axis=0)
    ss = jnp.sum(stats[:, 1, :c], axis=0)
    mean = s / m
    var = jnp.maximum(ss / m - mean * mean, 0.0)       # biased batch variance
    inv = jax.lax.rsqrt(var + _BN_EPS)
    scale = gamma * inv
    shift = beta - mean * scale
    return scale[None, :], shift[None, :]


@functools.partial(jax.jit, static_argnames=("relu",))
def _affine(x2, scale, shift, relu):
    M, C = x2.shape
    Mp = _round_up(M, 8)
    tr = _pick_rows(Mp, C, 2)
    xp = jnp.pad(x2, ((0, Mp - M), (0, 0))) if Mp != M else x2
    out = pl.pallas_call(
        functools.partial(_scale_shift_kernel, relu=relu),
        out_shape=jax.ShapeDtypeStruct((Mp, C), jnp.bfloat16),
        grid=(Mp // tr,),
        in_specs=[pl.BlockSpec((tr, C), lambda i: (i, 0)),
                  pl.BlockSpec((1, C), lambda i: (0, 0)),
                  pl.BlockSpec((1, C), lambda i: (0, 0))],
        out_specs=pl.BlockSpec((tr, C), lambda i: (i, 0)),
        compiler_params=_cparams("parallel"),
    )(xp, scale, shift)
    return out[:M]


@jax.jit
def _affine_add_relu(x2, scale, shift, res2):
    M, C = x2.shape
    Mp = _round_up(M, 8)
    tr = _pick_rows(Mp, C, 3)
    xp = jnp.pad(x2, ((0, Mp - M), (0, 0))) if Mp != M else x2
    rp = jnp.pad(res2, ((0, Mp - M), (0, 0))) if Mp != M else res2
    out = pl.pallas_call(
        _scale_shift_add_relu_kernel,
        out_shape=jax.ShapeDtypeStruct((Mp, C), jnp.bfloat16),
        grid=(Mp // tr,),
        in_specs=[pl.BlockSpec((tr, C), lambda i: (i, 0)),
                  pl.BlockSpec((1, C), lambda i: (0, 0)),
                  pl.BlockSpec((1, C), lambda i: (0, 0)),
                  pl.BlockSpec((tr, C), lambda i: (i, 0))],
        out_specs=pl.BlockSpec((tr, C), lambda i: (i, 0)),
        compiler_params=_cparams("parallel"),
    )(xp, scale, shift, rp)
    return out[:M]


@functools.partial(jax.jit, static_argnums=(0,))
def _tap_reduce(op, *views):
    """Row-tiled max/mean over k*k shifted (M, C) views; no stacked HBM copy."""
    ntap = len(views)
    M, C = views[0].shape
    Mp = _round_up(M, 8)
    tr = _pick_rows(Mp, C, ntap + 1)
    if Mp != M:
        views = tuple(jnp.pad(v, ((0, Mp - M), (0, 0))) for v in views)
    out = pl.pallas_call(
        functools.partial(_tap_reduce_kernel, ntap=ntap, op=op),
        out_shape=jax.ShapeDtypeStruct((Mp, C), views[0].dtype),
        grid=(Mp // tr,),
        in_specs=[pl.BlockSpec((tr, C), lambda i: (i, 0)) for _ in range(ntap)],
        out_specs=pl.BlockSpec((tr, C), lambda i: (i, 0)),
        compiler_params=_cparams("parallel"),
    )(*views)
    return out[:M]


@jax.jit
def _global_avg_pool(x):
    n, h, w, c = x.shape
    hw = h * w
    x3 = x.reshape(n, hw, c)
    cp = _round_up(c, 128)
    tc = _pick_div(cp, (512, 256, 128))
    if cp != c:
        x3 = jnp.pad(x3, ((0, 0), (0, 0), (0, cp - c)))
    out = pl.pallas_call(
        _gap_kernel,
        out_shape=jax.ShapeDtypeStruct((n, cp), jnp.float32),
        grid=(cp // tc,),
        in_specs=[pl.BlockSpec((n, hw, tc), lambda i: (0, 0, i))],
        out_specs=pl.BlockSpec((n, tc), lambda i: (0, i)),
        compiler_params=_cparams("parallel"),
    )(x3)
    return out[:, :c]


# ------------------------------ JAX glue ops --------------------------------

def _extract_patch_views(x, ksize, stride, padding, pad_value=0.0):
    """Return list of k*k strided (M, C) window views + output dims."""
    # TODO(synk): XLA still materializes these shifted slices (and their concat
    # for the conv im2col); fully kernel-side patch DMA would remove the k*k
    # HBM write/read amplification on the 3x3 convs.
    n, h, w, c = x.shape
    if padding:
        x = jnp.pad(x, ((0, 0), (padding, padding), (padding, padding), (0, 0)),
                    constant_values=pad_value)
    ho = (h + 2 * padding - ksize) // stride + 1
    wo = (w + 2 * padding - ksize) // stride + 1
    views = []
    for dy in range(ksize):
        for dx in range(ksize):
            v = x[:, dy:dy + stride * ho:stride, dx:dx + stride * wo:stride, :]
            views.append(v.reshape(n * ho * wo, c))
    return views, (n, ho, wo)


def conv_bn(x, weight, gamma, beta, *, ksize, stride, padding,
            grouped=False, relu=True, residual=None):
    """conv (bias-free) -> BN(batch stats) -> [+residual] -> [ReLU], NHWC bf16."""
    n_, h, w_, c = x.shape
    if ksize == 1:
        if stride != 1:
            x = x[:, ::stride, ::stride, :]
            n_, h, w_, c = x.shape
        a = x.reshape(n_ * h * w_, c)
        n, ho, wo = n_, h, w_
    else:
        views, (n, ho, wo) = _extract_patch_views(x, ksize, stride, padding)
        a = jnp.concatenate(views, axis=1)        # (M, k*k*C), tap-major columns
    M = n * ho * wo
    cout = gamma.shape[0]
    if grouped:
        out_p, stats = _grouped_matmul_stats(a, weight)
    else:
        out_p, stats = _dense_matmul(a, weight)
    scale, shift = _bn_coeffs(stats, gamma, beta, jnp.float32(M))
    out2 = out_p[:M, :cout]
    if residual is not None:
        y = _affine_add_relu(out2, scale, shift, residual.reshape(M, cout))
    else:
        y = _affine(out2, scale, shift, relu=relu)
    return y.reshape(n, ho, wo, cout)


def max_pool(x, ksize, stride, padding):
    views, (n, ho, wo) = _extract_patch_views(x, ksize, stride, padding,
                                              pad_value=-jnp.inf)
    y = _tap_reduce("max", *views)
    return y.reshape(n, ho, wo, x.shape[-1])


def avg_pool2(x):
    # AvgPool2d(2, stride=2, ceil_mode=True, count_include_pad=False)
    # TODO(synk): ceil_mode partial windows (odd H/W) not handled; all 'd'-variant
    # shortcut inputs in this network have even spatial sizes.
    views, (n, ho, wo) = _extract_patch_views(x, 2, 2, 0)
    y = _tap_reduce("mean", *views)
    return y.reshape(n, ho, wo, x.shape[-1])


# ------------------------- parameter initialization -------------------------

def _conv_weight(key, ksize, cin, cout):
    """Dense conv weight as a (round8(k*k*cin), round128(cout)) bf16 matrix."""
    fan_in = ksize * ksize * cin
    std = (2.0 / fan_in) ** 0.5
    k = ksize * ksize * cin
    w = jax.random.normal(key, (k, cout), jnp.float32) * std
    kp, np_ = _round_up(k, 8), _round_up(cout, 128)
    if (kp, np_) != (k, cout):
        w = jnp.pad(w, ((0, kp - k), (0, np_ - cout)))
    return w.astype(jnp.bfloat16)


def _grouped_conv_weight(key, width, groups, tn=128):
    """Grouped 3x3 weight stored banded: width/tn bands of (9*tn, tn).

    Row order inside a band/tap block is (group_local, cin_local); the grouped-conv
    zero structure is preserved exactly while keeping each matmul lane-dense.
    """
    ci = width // groups
    fan_in = 9 * ci
    std = (2.0 / fan_in) ** 0.5
    wg = jax.random.normal(key, (groups, 9, ci, ci), jnp.float32) * std
    gpb = tn // ci                      # groups per 128-wide band
    nb = width // tn
    wg = wg.reshape(nb, gpb, 9, ci, ci)
    eye = jnp.eye(gpb, dtype=jnp.float32)
    band = jnp.einsum("bgtio,gh->btgiho", wg, eye).reshape(nb * 9 * tn, tn)
    return band.astype(jnp.bfloat16)


def _bn_p(c):
    return (jnp.ones((c,), jnp.float32), jnp.zeros((c,), jnp.float32))


def init_params(key, n_class):
    keys = iter(jax.random.split(key, 128))
    params = {"stem": {
        "w1": _conv_weight(next(keys), 3, 3, 32),  "bn1": _bn_p(32),
        "w2": _conv_weight(next(keys), 3, 32, 32), "bn2": _bn_p(32),
        "w3": _conv_weight(next(keys), 3, 32, 64), "bn3": _bn_p(64),
    }}
    layers = []
    inplanes = 64
    for planes, n_blocks, stride in ((64, 3, 1), (128, 4, 2), (256, 6, 2), (512, 3, 2)):
        width = int(planes * (_BASE_WIDTH / 64.0)) * _CARDINALITY
        outplanes = planes * _EXPANSION
        blocks = []
        for bi in range(n_blocks):
            s = stride if bi == 0 else 1
            bp = {
                "stride": s,
                "w1": _conv_weight(next(keys), 1, inplanes, width), "bn1": _bn_p(width),
                "w2": _grouped_conv_weight(next(keys), width, _CARDINALITY),
                "bn2": _bn_p(width),
                "w3": _conv_weight(next(keys), 1, width, outplanes), "bn3": _bn_p(outplanes),
            }
            if s != 1 or inplanes != outplanes:
                bp["down_avg"] = (s != 1)                      # avg_down 'd' shortcut
                bp["down_w"] = _conv_weight(next(keys), 1, inplanes, outplanes)
                bp["down_bn"] = _bn_p(outplanes)
            blocks.append(bp)
            inplanes = outplanes
        layers.append(blocks)
    params["layers"] = layers
    params["fc_w"] = jax.random.normal(next(keys), (inplanes, n_class), jnp.float32) * 0.01
    params["fc_b"] = jnp.zeros((n_class,), jnp.float32)
    return params


# ------------------------------- forward pass --------------------------------

def bottleneck_forward(x, bp):
    shortcut = x
    out = conv_bn(x, bp["w1"], *bp["bn1"], ksize=1, stride=1, padding=0)
    out = conv_bn(out, bp["w2"], *bp["bn2"], ksize=3, stride=bp["stride"],
                  padding=1, grouped=True)
    if "down_w" in bp:
        s = shortcut
        if bp["down_avg"]:
            s = avg_pool2(s)
        shortcut = conv_bn(s, bp["down_w"], *bp["down_bn"],
                           ksize=1, stride=1, padding=0, relu=False)
    # conv3 -> bn3 -> (+shortcut) -> relu (add+relu fused into the affine kernel)
    return conv_bn(out, bp["w3"], *bp["bn3"], ksize=1, stride=1, padding=0,
                   residual=shortcut)


def head(x, fc_w, fc_b):
    pooled = _global_avg_pool(x)                                   # (N, 2048) f32
    n = pooled.shape[0]
    nc = fc_w.shape[1]
    a = jnp.concatenate([pooled, jnp.ones((n, 1), jnp.float32)], axis=1)
    w = jnp.concatenate([fc_w, fc_b[None, :]], axis=0)             # bias folded in
    kp, np_ = _round_up(w.shape[0], 8), _round_up(nc, 128)
    w = jnp.pad(w, ((0, kp - w.shape[0]), (0, np_ - nc)))
    out, _ = _dense_matmul(a, w, out_dtype=jnp.float32, with_stats=False)
    return out[:n, :nc]


def resnext50d_forward(params, x_nchw):
    x = jnp.transpose(x_nchw, (0, 2, 3, 1)).astype(jnp.bfloat16)   # NCHW -> NHWC bf16
    sp = params["stem"]
    x = conv_bn(x, sp["w1"], *sp["bn1"], ksize=3, stride=2, padding=1)
    x = conv_bn(x, sp["w2"], *sp["bn2"], ksize=3, stride=1, padding=1)
    x = conv_bn(x, sp["w3"], *sp["bn3"], ksize=3, stride=1, padding=1)
    x = max_pool(x, 3, 2, 1)                                       # MaxPool2d(3, 2, 1)
    for blocks in params["layers"]:
        for bp in blocks:
            x = bottleneck_forward(x, bp)
    return head(x, params["fc_w"], params["fc_b"])                 # (N, n_class) f32


if __name__ == "__main__":
    key = jax.random.PRNGKey(0)
    pkey, xkey = jax.random.split(key)
    n_class = 10
    params = init_params(pkey, n_class)
    # Small input consistent with the module's forward: NCHW image batch.
    x = jax.random.normal(xkey, (2, 3, 32, 32), jnp.float32)
    logits = resnext50d_forward(params, x)
    logits = jax.block_until_ready(logits)
    assert logits.shape == (2, n_class), logits.shape
    assert bool(jnp.isfinite(logits).all())
    print("KERNEL_OK")
</pallas_src>

<mosaic_0001>
module attributes {stable_mosaic.version = 11 : i64} {
  func.func @_matmul_bn_kernel(%arg0: i32, %arg1: i32, %arg2: i32, %arg3: memref<256x32xbf16, #tpu.memory_space<vmem>>, %arg4: memref<32x128xbf16, #tpu.memory_space<vmem>>, %arg5: memref<256x128xbf16, #tpu.memory_space<vmem>>, %arg6: memref<1x2x128xf32, #tpu.memory_space<vmem>>, %arg7: memref<256x128xf32, #tpu.memory_space<vmem>>) attributes {dimension_semantics = [#tpu.dimension_semantics<parallel>, #tpu.dimension_semantics<parallel>, #tpu.dimension_semantics<arbitrary>], iteration_bounds = array<i64: 2, 1, 1>, scalar_prefetch = 0 : i64, scratch_operands = 1 : i64, tpu.core_type = #tpu.core_type<tc>, window_params = [{transform_indices = @transform_0, window_bounds = array<i64: 256, 32>}, {transform_indices = @transform_1, window_bounds = array<i64: 32, 128>}, {transform_indices = @transform_2, window_bounds = array<i64: 256, 128>}, {transform_indices = @transform_3, window_bounds = array<i64: 1, 2, 128>}]} {
    %c0_i32 = arith.constant 0 : i32
    %0 = arith.cmpi eq, %arg2, %c0_i32 : i32
    %1 = arith.extui %0 : i1 to i32
    %c0_i32_0 = arith.constant 0 : i32
    %2 = arith.cmpi ne, %1, %c0_i32_0 : i32
    scf.if %2 {
      %cst_10 = arith.constant 0.000000e+00 : f32
      %12 = vector.broadcast %cst_10 : f32 to vector<256x128xf32>
      %c0_11 = arith.constant 0 : index
      %c0_12 = arith.constant 0 : index
      %13 = vector.load %arg7[%c0_11, %c0_12] : memref<256x128xf32, #tpu.memory_space<vmem>>, vector<256x128xf32>
      tpu.vector_store %arg7[%c0_11, %c0_12], %12 {strides = array<i32>} : memref<256x128xf32, #tpu.memory_space<vmem>>, vector<256x128xf32>,
    } else {
    }
    %c0 = arith.constant 0 : index
    %c0_1 = arith.constant 0 : index
    %3 = vector.load %arg7[%c0, %c0_1] : memref<256x128xf32, #tpu.memory_space<vmem>>, vector<256x128xf32>
    %c0_2 = arith.constant 0 : index
    %c0_3 = arith.constant 0 : index
    %4 = vector.load %arg3[%c0_2, %c0_3] : memref<256x32xbf16, #tpu.memory_space<vmem>>, vector<256x32xbf16>
    %c0_4 = arith.constant 0 : index
    %c0_5 = arith.constant 0 : index
    %5 = vector.load %arg4[%c0_4, %c0_5] : memref<32x128xbf16, #tpu.memory_space<vmem>>, vector<32x128xbf16>
    %cst = arith.constant dense<0.000000e+00> : vector<256x128xf32>
    %6 = tpu.matmul %4, %5, %cst {dimension_numbers = #tpu.dot_dimension_numbers<[1], [0], [0], [1], [0, 0, 1, 1], [], []>} : vector<256x32xbf16>, vector<32x128xbf16>, vector<256x128xf32> -> vector<256x128xf32>
    %7 = arith.addf %3, %6 : vector<256x128xf32>
    %c0_6 = arith.constant 0 : index
    %c0_7 = arith.constant 0 : index
    %8 = vector.load %arg7[%c0_6, %c0_7] : memref<256x128xf32, #tpu.memory_space<vmem>>, vector<256x128xf32>
    tpu.vector_store %arg7[%c0_6, %c0_7], %7 {strides = array<i32>} : memref<256x128xf32, #tpu.memory_space<vmem>>, vector<256x128xf32>,
    %c0_i32_8 = arith.constant 0 : i32
    %9 = arith.cmpi eq, %arg2, %c0_i32_8 : i32
    %10 = arith.extui %9 : i1 to i32
    %c0_i32_9 = arith.constant 0 : i32
    %11 = arith.cmpi ne, %10, %c0_i32_9 : i32
    scf.if %11 {
      %c0_10 = arith.constant 0 : index
      %c0_11 = arith.constant 0 : index
      %12 = vector.load %arg7[%c0_10, %c0_11] : memref<256x128xf32, #tpu.memory_space<vmem>>, vector<256x128xf32>
      %13 = arith.truncf %12 : vector<256x128xf32> to vector<256x128xbf16>
      %c0_12 = arith.constant 0 : index
      %c0_13 = arith.constant 0 : index
      %14 = vector.load %arg5[%c0_12, %c0_13] : memref<256x128xbf16, #tpu.memory_space<vmem>>, vector<256x128xbf16>
      tpu.vector_store %arg5[%c0_12, %c0_13], %13 {strides = array<i32>} : memref<256x128xbf16, #tpu.memory_space<vmem>>, vector<256x128xbf16>,
      %cst_14 = arith.constant dense<0.000000e+00> : vector<128xf32>
      %15 = vector.multi_reduction <add>, %12, %cst_14 [0] : vector<256x128xf32> to vector<128xf32>
      %16 = vector.shape_cast %15 : vector<128xf32> to vector<1x128xf32>
      %17 = arith.mulf %12, %12 : vector<256x128xf32>
      %cst_15 = arith.constant dense<0.000000e+00> : vector<128xf32>
      %18 = vector.multi_reduction <add>, %17, %cst_15 [0] : vector<256x128xf32> to vector<128xf32>
      %19 = vector.shape_cast %18 : vector<128xf32> to vector<1x128xf32>
      %20 = tpu.concatenate %16, %19 in 0 : vector<1x128xf32>, vector<1x128xf32> -> vector<2x128xf32>
      %21 = vector.shape_cast %20 : vector<2x128xf32> to vector<1x2x128xf32>
      %c0_16 = arith.constant 0 : index
      %c0_17 = arith.constant 0 : index
      %c0_18 = arith.constant 0 : index
      %22 = vector.load %arg6[%c0_16, %c0_17, %c0_18] : memref<1x2x128xf32, #tpu.memory_space<vmem>>, vector<1x2x128xf32>
      tpu.vector_store %arg6[%c0_16, %c0_17, %c0_18], %21 {strides = array<i32>} : memref<1x2x128xf32, #tpu.memory_space<vmem>>, vector<1x2x128xf32>,
    } else {
    }
    return
  }
  func.func @transform_0(%arg0: i32, %arg1: i32, %arg2: i32) -> (i32, i32) {
    %c0_i32 = arith.constant 0 : i32
    return %arg0, %arg2 : i32, i32
  }
  func.func @transform_1(%arg0: i32, %arg1: i32, %arg2: i32) -> (i32, i32) {
    %c0_i32 = arith.constant 0 : i32
    return %arg2, %arg1 : i32, i32
  }
  func.func @transform_2(%arg0: i32, %arg1: i32, %arg2: i32) -> (i32, i32) {
    %c0_i32 = arith.constant 0 : i32
    return %arg0, %arg1 : i32, i32
  }
  func.func @transform_3(%arg0: i32, %arg1: i32, %arg2: i32) -> (i32, i32, i32) {
    %c0_i32 = arith.constant 0 : i32
    %c0_i32_0 = arith.constant 0 : i32
    return %arg0, %c0_i32, %arg1 : i32, i32, i32
  }
}

</mosaic_0001>

<bundles_post_ra>
// kernel: _dense_matmul.1
= control target key start
LH: loop header
LB: loop body
LE: loop exit
PB: predicated region body
PF: predicated region fallthrough
CT: control target
= control target key end

     0   :  { %9 = vsyncpa [#allocation4], 0  ;;  %s1980_s0 = inlined_call_operand.vmem [shape: bf16[512,32], index: 0, kind: input, shape index: {}]   ;;  %s1981_s1 = inlined_call_operand.vmem [shape: bf16[32,128], index: 1, kind: input, shape index: {}]   ;;  %s1982_s2 = inlined_call_operand.hbm [shape: bf16[512,128], index: 2, kind: output, shape index: {0}]   ;;  %s1983_s3 = inlined_call_operand.hbm [shape: f32[2,2,128], index: 3, kind: output, shape index: {1}]  }
   0x1   :  { %11 = vsyncpa [#allocation4 + $0x1], 0 }
   0x2   :  { %12 = vsyncpa [#allocation6], 0 }
   0x3   :  { %14 = vsyncpa [#allocation6 + $0x1], 0  ;;  %s1673_s12 = smov 0   ;;  %s1675_s13 = smov 0  }
   0x4   :  { %s1677_s14 = smov 0   ;;  %s1679_s15 = smov 0  }
   0x5   :  { %s1681_s16 = smov 0   ;;  %s1683_s17 = smov 0  }
   0x6 LB: > { %s1188_s18 = sadd.s32 4294967295, %s1647_s17   ;;  %s1189_s19 = sadd.s32 4294967294, %s1647_s17   ;;  %s1647_s17 = sphi %s1683_s17, %s20_s17   ;;  %s1643_s16 = sphi %s1681_s16, %s1990_s16   ;;  %s1639_s15 = sphi %s1679_s15, %s1989_s15   ;;  %s1635_s14 = sphi %s1677_s14, %s1988_s14   ;;  %s1631_s13 = sphi %s1675_s13, %s1987_s13   ;;  %s1627_s12 = sphi %s1673_s12, %s1986_s12  }
   0x7   : > { %s39_s20 = sadd.s32 1, %s1643_s16  ;;  %s104_s21 = sadd.s32 1, %s1635_s14 }
   0x8   : > { %p41_p0 = scmp.ge.s32.totalorder %s39_s20, 2  ;;  %p114_p1 = scmp.ne.s32.totalorder %s1635_s14, %s1631_s13 }
   0x9   : > { %p115_p2 = scmp.eq.s32.totalorder %s1188_s18, 1  ;;  %p120_p3 = scmp.ne.s32.totalorder %s1631_s13, %s1627_s12 }
   0xa   : > { %s1992_s20 = smov (%p41_p0, %s39_s20), 0  ;;  %p121_p5 = scmp.eq.s32.totalorder %s1189_s19, 1 }
   0xb   : > { %p1713_p4 = por %p115_p2, %p114_p1  ;;  %s99_s23 = ssub.s32 %s1643_s16, %s1992_s20 }
   0xc   : > { %p1193_p6 = scmp.ge.s32.totalorder %s1647_s17, 1  ;;  %p102_p7 = scmp.eq.s32.totalorder %s99_s23, 0 }
   0xd   : > { %p1720_p8 = por %p121_p5, %p120_p3  ;;  %p191_p9 = scmp.lt.s32.totalorder %s1647_s17, 3 }
   0xe   : > { %s1726_s25 = scalar_select %p102_p7, %s1635_s14, %s104_s21  }
   0xf   : > { %p192_p10 = pnand %p1193_p6, %p191_p9 }
  0x10   : > { %v1519_v0 = vld [vmem:[%s1981_s1] sm:$0xff] (!%p192_p10)   ;;  %s1732_s28 = sshll.u32 (!%p192_p10), %s1639_s15, 5  ;;  %v1520_v1 = vld [vmem:[%s1981_s1 + $0x8] sm:$0xff] (!%p192_p10)   ;;  %vm447_vm0 = vcmask (!%p192_p10), 261120   ;;  %s1777_s9 = sand.u32 (!%p192_p10), 1, %s1631_s13  }
  0x11   : > { %195 = sbr.rel (%p192_p10) target bundleno = 347 (0x15b), region = 28  ;;  %p232_p11 = scmp.lt.s32.totalorder (!%p192_p10), %s1732_s28, 63  ;;  %1417 = vmatprep.subr.bf16.mxu0 (!%p192_p10), %v1519_v0  ;;  %1453 = vmatprep.subr.bf16.mxu1 (!%p192_p10), %v1519_v0 }
  0x12   : > { %1418 = vmatpush3.bf16.msra.mxu0 (!%p192_p10), %v1519_v0  ;;  %1455 = vmatpush3.bf16.msra.mxu1 (!%p192_p10), %v1519_v0  ;;  %s1194_s10 = sshll.u32 (!%p192_p10), %s1777_s9, 7  ;;  %s1303_s18 = sshll.u32 (!%p192_p10), %s1639_s15, 11 }
  0x13   : > { %1419 = vmatprep.subr.bf16.mxu0 (!%p192_p10), %v1520_v1  ;;  %1454 = vmatprep.subr.bf16.mxu1 (!%p192_p10), %v1520_v1  ;;  %s1780_s11 = scalar_lea.vmem (!%p192_p10), [#allocation3], %s1194_s10  ;;  %s1850_s15 = scalar_lea.hbm (!%p192_p10), %s1982_s2, %s1303_s18 }
  0x14   : > { %s1045_s19 = sshll.u32 (!%p192_p10), %s1780_s11, 4  ;;  %s1026_s26 = scalar_lea.sflag (!%p192_p10), [#allocation4], %s1777_s9  ;;  %s1852_s19 = int_to_ptr.vmem [resolvable:$true] %s1045_s19 }
  0x15   : > { %s1537_s27 = scalar_lea.vmem (!%p192_p10), %s1852_s19, 2048  ;;  %s1649_s29 = smov (!%p192_p10), [#allocation3]  }
  0x16   : > { %1420 = vmatpush3.bf16.msra.mxu0 (!%p192_p10), %v1520_v1  ;;  %1456 = vmatpush3.bf16.msra.mxu1 (!%p192_p10), %v1520_v1  ;;  %p1538_p12 = scmp.ne.s32.totalorder (!%p192_p10), %s1852_s19, %s1537_s27  ;;  %s1541_s30 = sshll.u32 (!%p192_p10), %s1649_s29, 4  ;;  %s1542_s30 = int_to_ptr.vmem [resolvable:$false] %s1541_s30 }
  0x17   : > { %p1544_p1 = scmp.lt.s32.totalorder (!%p192_p10), %s1852_s19, %s1542_s30 }
  0x18   : > { %s233_s4 = scalar_select %p232_p11, %s1732_s28, 63 }
  0x19   : > { %p1539_p13 = pnand %p1538_p12, %p1713_p4 }
  0x1a   : > { %s1197_s5 = sshll.u32 %s233_s4, 2  ;;  %s1543_s4 = scalar_lea.vmem %s1542_s30, 4096 }
  0x1b   : > { %s1742_s8 = scalar_lea.vmem %s1980_s0, %s1197_s5  ;;  %p1540_p0 = pneg %p1539_p13 }
  0x1c   : > { %v1521_v2 = vld [vmem:[%s1742_s8] sm:$0xff]   ;;  %v1522_v3 = vld [vmem:[%s1742_s8 + $0x8] sm:$0xff]   ;;  %v1523_v4 = vld [vmem:[%s1742_s8 + $0x10] sm:$0xff]   ;;  %p1545_p2 = scmp.lt.s32.totalorder %s1543_s4, %s1537_s27 }
  0x1d   : > { %1421 = vmatprep.mubr.msk.bf16.mxu0 %vm447_vm0, %v1521_v2  ;;  %v1524_v5 = vld [vmem:[%s1742_s8 + $0x18] sm:$0xff]   ;;  %v1525_v6 = vld [vmem:[%s1742_s8 + $0x20] sm:$0xff]   ;;  %v1530_v8 = vld [vmem:[%s1742_s8 + $0x48] sm:$0xff]  }
  0x1e   : > { %1422 = vmatmul.mubr.msk.bf16.vlgmr.msra.gmra.mrb[0].mxu0 %vm447_vm0, %v1522_v3  ;;  %v1529_v7 = vld [vmem:[%s1742_s8 + $0x40] sm:$0xff]   ;;  %v1531_v9 = vld [vmem:[%s1742_s8 + $0x50] sm:$0xff]   ;;  %v1526_v10 = vld [vmem:[%s1742_s8 + $0x28] sm:$0xff]   ;;  %p1546_p3 = por %p1545_p2, %p1544_p1 }
  0x1f   : > { %1425 = vmatprep.mubr.msk.bf16.mxu0 %vm447_vm0, %v1523_v4  ;;  %1437 = vmatprep.mubr.msk.bf16.mxu1 %vm447_vm0, %v1529_v7  ;;  %v1532_v11 = vld [vmem:[%s1742_s8 + $0x58] sm:$0xff]   ;;  %v1527_v12 = vld [vmem:[%s1742_s8 + $0x30] sm:$0xff]   ;;  %v1533_v13 = vld [vmem:[%s1742_s8 + $0x60] sm:$0xff]  }
  0x20   : > { %1438 = vmatmul.mubr.msk.bf16.vlgmr.msra.gmra.mrb[0].mxu1 %vm447_vm0, %v1530_v8  ;;  %v1528_v14 = vld [vmem:[%s1742_s8 + $0x38] sm:$0xff]   ;;  %v1534_v15 = vld [vmem:[%s1742_s8 + $0x68] sm:$0xff]   ;;  %v1535_v16 = vld [vmem:[%s1742_s8 + $0x70] sm:$0xff]   ;;  %p1547_p5 = pnand %p1546_p3, %p1540_p0 }
  0x21   : > { %1441 = vmatprep.mubr.msk.bf16.mxu1 %vm447_vm0, %v1531_v9  ;;  %v1536_v17 = vld [vmem:[%s1742_s8 + $0x78] sm:$0xff]  }
  0x26   : > { %1426 = vmatmul.mubr.msk.bf16.gmra.mrb[4].mxu0 %vm447_vm0, %v1524_v5 }
  0x27   : > { %1429 = vmatprep.mubr.msk.bf16.mxu0 %vm447_vm0, %v1525_v6 }
  0x28   : > { %1442 = vmatmul.mubr.msk.bf16.gmra.mrb[4].mxu1 %vm447_vm0, %v1532_v11 }
  0x29   : > { %1445 = vmatprep.mubr.msk.bf16.mxu1 %vm447_vm0, %v1533_v13 }
  0x2e   : > { %1430 = vmatmul.mubr.msk.bf16.gmra.mrb[8].mxu0 %vm447_vm0, %v1526_v10 }
  0x2f   : > { %1433 = vmatprep.mubr.msk.bf16.mxu0 %vm447_vm0, %v1527_v12 }
  0x30   : > { %1446 = vmatmul.mubr.msk.bf16.gmra.mrb[8].mxu1 %vm447_vm0, %v1534_v15 }
  0x31   : > { %1449 = vmatprep.mubr.msk.bf16.mxu1 %vm447_vm0, %v1535_v16 }
  0x36   : > { %1434 = vmatmul.mubr.msk.bf16.gmra.mrb[12].mxu0 %vm447_vm0, %v1528_v14 }
  0x38   : > { %1450 = vmatmul.mubr.msk.bf16.gmra.mrb[12].mxu1 %vm447_vm0, %v1536_v17 }
  0xf1   : > { %v1423_v18 = vpop.f32.mrb[0].mxu0 }
  0xf2   : > { %v530_v19 = vpop.f32.mrb[1].mxu0  ;;  %v955_v27 = vmul.f32 %v1423_v18, %v1423_v18 }
  0xf3   : > { %v1424_v20 = vpop.f32.mrb[2].mxu0  ;;  %v953_v23 = vmul.f32 %v530_v19, %v530_v19  ;;  %v1784_v34 = vpop.f32.mrb[0].mxu1 }
  0xf4   : > { %v1312_v21 = vpack.c.bf16 %v1424_v20, %v1423_v18  ;;  %v533_v22 = vpop.f32.mrb[3].mxu0  ;;  %v956_v30 = vmul.f32 %v1424_v20, %v1424_v20  ;;  %v1786_v36 = vpop.f32.mrb[1].mxu1 }
  0xf5   : > { %v1307_v24 = vpack.c.bf16 %v533_v22, %v530_v19  ;;  %v916_v25 = vadd.f32 %v533_v22, %v530_v19  ;;  %v954_v26 = vmul.f32 %v533_v22, %v533_v22  ;;  %v1788_v41 = vpop.f32.mrb[2].mxu1 }
  0xf6   : > { %1384 = vst [vmem:[%s1780_s11 + $0x8] sm:$0xff] %v1312_v21   ;;  %v1352_v44 = vpack.c.bf16 %v1788_v41, %v1784_v34  ;;  %v1792_v45 = vpop.f32.mrb[3].mxu1 }
  0xf7   : > { %1308 = vst [vmem:[%s1780_s11] sm:$0xff] %v1307_v24   ;;  %v917_v28 = vadd.f32 %v1423_v18, %v916_v25  ;;  %v985_v29 = vadd.f32 %v954_v26, %v953_v23  ;;  %v1347_v50 = vpack.c.bf16 %v1792_v45, %v1786_v36 }
  0xf8   : > { %1392 = vst [vmem:[%s1780_s11 + $0x48] sm:$0xff] %v1352_v44   ;;  %v969_v44 = vmul.f32 %v1786_v36, %v1786_v36 }
  0xf9   : > { %v986_v31 = vadd.f32 %v985_v29, %v955_v27  ;;  %v1427_v32 = vpop.f32.mrb[4].mxu0  ;;  %v918_v33 = vadd.f32 %v1424_v20, %v917_v28  ;;  %1391 = vst [vmem:[%s1780_s11 + $0x40] sm:$0xff] %v1347_v50  }
  0xfa   : > { %v546_v35 = vpop.f32.mrb[5].mxu0  ;;  %v959_v51 = vmul.f32 %v1427_v32, %v1427_v32 }
  0xfb   : > { %v919_v37 = vadd.f32 %v918_v33, %v546_v35  ;;  %v957_v38 = vmul.f32 %v546_v35, %v546_v35  ;;  %v987_v39 = vadd.f32 %v986_v31, %v956_v30  ;;  %v1428_v40 = vpop.f32.mrb[6].mxu0  ;;  %v1800_v58 = vpop.f32.mrb[4].mxu1 }
  0xfc   : > { %v1322_v42 = vpack.c.bf16 %v1428_v40, %v1427_v32  ;;  %v549_v43 = vpop.f32.mrb[7].mxu0  ;;  %v960_v54 = vmul.f32 %v1428_v40, %v1428_v40  ;;  %v1802_v60 = vpop.f32.mrb[5].mxu1 }
  0xfd   : > { %v988_v46 = vadd.f32 %v987_v39, %v957_v38  ;;  %v1317_v47 = vpack.c.bf16 %v549_v43, %v546_v35  ;;  %v920_v48 = vadd.f32 %v919_v37, %v549_v43  ;;  %v958_v49 = vmul.f32 %v549_v43, %v549_v43  ;;  %v1804_v1 = vpop.f32.mrb[6].mxu1 }
  0xfe   : > { %1386 = vst [vmem:[%s1780_s11 + $0x18] sm:$0xff] %v1322_v42   ;;  %v1362_v4 = vpack.c.bf16 %v1804_v1, %v1800_v58  ;;  %v1808_v5 = vpop.f32.mrb[7].mxu1 }
  0xff   : > { %1385 = vst [vmem:[%s1780_s11 + $0x10] sm:$0xff] %v1317_v47   ;;  %v921_v52 = vadd.f32 %v1427_v32, %v920_v48  ;;  %v989_v53 = vadd.f32 %v988_v46, %v958_v49  ;;  %v1357_v10 = vpack.c.bf16 %v1808_v5, %v1802_v60 }
 0x100   : > { %1394 = vst [vmem:[%s1780_s11 + $0x58] sm:$0xff] %v1362_v4  }
 0x101   : > { %v990_v55 = vadd.f32 %v989_v53, %v959_v51  ;;  %v1431_v56 = vpop.f32.mrb[8].mxu0  ;;  %v922_v57 = vadd.f32 %v1428_v40, %v921_v52  ;;  %1393 = vst [vmem:[%s1780_s11 + $0x50] sm:$0xff] %v1357_v10  }
 0x102   : > { %v562_v59 = vpop.f32.mrb[9].mxu0  ;;  %v963_v11 = vmul.f32 %v1431_v56, %v1431_v56 }
 0x103   : > { %v923_v61 = vadd.f32 %v922_v57, %v562_v59  ;;  %v961_v62 = vmul.f32 %v562_v59, %v562_v59  ;;  %v991_v63 = vadd.f32 %v990_v55, %v960_v54  ;;  %v1432_v0 = vpop.f32.mrb[10].mxu0  ;;  %v1816_v18 = vpop.f32.mrb[8].mxu1  ;;  %v970_v54 = vmul.f32 %v1792_v45, %v1792_v45 }
 0x104   : > { %v1332_v2 = vpack.c.bf16 %v1432_v0, %v1431_v56  ;;  %v565_v3 = vpop.f32.mrb[11].mxu0  ;;  %v964_v14 = vmul.f32 %v1432_v0, %v1432_v0  ;;  %v1818_v20 = vpop.f32.mrb[9].mxu1 }
 0x105   : > { %v992_v6 = vadd.f32 %v991_v63, %v961_v62  ;;  %v1327_v7 = vpack.c.bf16 %v565_v3, %v562_v59  ;;  %v924_v8 = vadd.f32 %v923_v61, %v565_v3  ;;  %v962_v9 = vmul.f32 %v565_v3, %v565_v3  ;;  %v1820_v25 = vpop.f32.mrb[10].mxu1 }
 0x106   : > { %1388 = vst [vmem:[%s1780_s11 + $0x28] sm:$0xff] %v1332_v2   ;;  %v1372_v28 = vpack.c.bf16 %v1820_v25, %v1816_v18  ;;  %v1824_v29 = vpop.f32.mrb[11].mxu1 }
 0x107   : > { %1387 = vst [vmem:[%s1780_s11 + $0x20] sm:$0xff] %v1327_v7   ;;  %v925_v12 = vadd.f32 %v1431_v56, %v924_v8  ;;  %v993_v13 = vadd.f32 %v992_v6, %v962_v9  ;;  %v1367_v35 = vpack.c.bf16 %v1824_v29, %v1818_v20  ;;  %v971_v56 = vmul.f32 %v1784_v34, %v1784_v34 }
 0x108   : > { %1396 = vst [vmem:[%s1780_s11 + $0x68] sm:$0xff] %v1372_v28  }
 0x109   : > { %v994_v15 = vadd.f32 %v993_v13, %v963_v11  ;;  %v1435_v16 = vpop.f32.mrb[12].mxu0  ;;  %v926_v17 = vadd.f32 %v1432_v0, %v925_v12  ;;  %1395 = vst [vmem:[%s1780_s11 + $0x60] sm:$0xff] %v1367_v35  }
 0x10a   : > { %v578_v19 = vpop.f32.mrb[13].mxu0  ;;  %v967_v37 = vmul.f32 %v1435_v16, %v1435_v16 }
 0x10b   : > { %v927_v21 = vadd.f32 %v926_v17, %v578_v19  ;;  %v965_v22 = vmul.f32 %v578_v19, %v578_v19  ;;  %v995_v23 = vadd.f32 %v994_v15, %v964_v14  ;;  %v1436_v24 = vpop.f32.mrb[14].mxu0  ;;  %v1834_v46 = vpop.f32.mrb[12].mxu1 }
 0x10c   : > { %v1342_v26 = vpack.c.bf16 %v1436_v24, %v1435_v16  ;;  %v581_v27 = vpop.f32.mrb[15].mxu0  ;;  %v968_v40 = vmul.f32 %v1436_v24, %v1436_v24  ;;  %v1838_v47 = vpop.f32.mrb[13].mxu1 }
 0x10d   : > { %v996_v30 = vadd.f32 %v995_v23, %v965_v22  ;;  %v1337_v31 = vpack.c.bf16 %v581_v27, %v578_v19  ;;  %v928_v32 = vadd.f32 %v927_v21, %v581_v27  ;;  %v966_v33 = vmul.f32 %v581_v27, %v581_v27  ;;  %v1841_v50 = vpop.f32.mrb[14].mxu1 }
 0x10e   : > { %1390 = vst [vmem:[%s1780_s11 + $0x38] sm:$0xff] %v1342_v26   ;;  %v1382_v51 = vpack.c.bf16 %v1841_v50, %v1834_v46  ;;  %v1845_v52 = vpop.f32.mrb[15].mxu1 }
 0x10f   : > { %1389 = vst [vmem:[%s1780_s11 + $0x30] sm:$0xff] %v1337_v31   ;;  %v929_v38 = vadd.f32 %v1435_v16, %v928_v32  ;;  %v997_v39 = vadd.f32 %v996_v30, %v966_v33  ;;  %v1377_v55 = vpack.c.bf16 %v1845_v52, %v1838_v47 }
 0x110   : > { %1398 = vst [vmem:[%s1780_s11 + $0x78] sm:$0xff] %v1382_v51  }
 0x111   : > { %v998_v42 = vadd.f32 %v997_v39, %v967_v37  ;;  %v930_v43 = vadd.f32 %v1436_v24, %v929_v38  ;;  %1397 = vst [vmem:[%s1780_s11 + $0x70] sm:$0xff] %v1377_v55  }
 0x113   : > { %v931_v48 = vadd.f32 %v930_v43, %v1786_v36  ;;  %v999_v49 = vadd.f32 %v998_v42, %v968_v40 }
 0x115   : > { %v1000_v36 = vadd.f32 %v999_v49, %v969_v44  ;;  %v932_v53 = vadd.f32 %v931_v48, %v1792_v45 }
 0x117   : > { %v933_v57 = vadd.f32 %v1784_v34, %v932_v53  ;;  %v1001_v59 = vadd.f32 %v1000_v36, %v970_v54 }
 0x118   : > { %1550 = shalt.err (!%p1547_p5)
}
 0x119   : > { %s1551_s5 = scalar_lea.hbm %s1850_s15, 2048  ;;  %s1555_s8 = scalar_lea.hbm %s1982_s2, 4096 }
 0x11a   : > { %p1552_p6 = scmp.ne.s32.totalorder %s1850_s15, %s1551_s5  ;;  %p1556_p10 = scmp.lt.u32.totalorder %s1850_s15, %s1982_s2 }
 0x11b   : > { %p1557_p11 = scmp.lt.u32.totalorder %s1555_s8, %s1551_s5  ;;  %p1559_p13 = scmp.lt.u32.totalorder %s1551_s5, %s1850_s15 }
 0x11c   : > { %p1553_p7 = pnand %p1552_p6, %p1713_p4 }
 0x11d   : > { %p1558_p12 = por %p1557_p11, %p1556_p10 }
 0x11e   : > { %p1554_p9 = pneg %p1553_p7 }
 0x11f   : > { %p1560_p0 = por %p1559_p13, %p1558_p12 }
 0x121   : > { %p1561_p1 = pnand %p1560_p0, %p1554_p9 }
 0x123   : > { %1564 = shalt.err (!%p1561_p1)
}
 0x124   : > { %s1650_s18 = smov 64   ;;  %s1651_s21 = smov 4   ;;  %v972_v34 = vmul.f32 %v1788_v41, %v1788_v41  ;;  %v1002_v45 = vadd.f32 %v1001_v59, %v971_v56  ;;  %v934_v61 = vadd.f32 %v1788_v41, %v933_v57  ;;  %v973_v62 = vmul.f32 %v1802_v60, %v1802_v60 }
 0x125   : > { %1457 = dma.vmem_to_hbm [thread:$0]  (%p1713_p4), %s1852_s19, 2048, %s1850_s15, %s1026_s26, %s1650_s18, %s1650_s18, %s1651_s21   ;;  %v974_v4 = vmul.f32 %v1808_v5, %v1808_v5  ;;  %v975_v6 = vmul.f32 %v1800_v58, %v1800_v58  ;;  %v976_v41 = vmul.f32 %v1804_v1, %v1804_v1  ;;  %v978_v14 = vmul.f32 %v1824_v29, %v1824_v29 }
 0x126   : > { %v935_v63 = vadd.f32 %v934_v61, %v1802_v60  ;;  %v1003_v0 = vadd.f32 %v1002_v45, %v972_v34  ;;  %v977_v60 = vmul.f32 %v1818_v20, %v1818_v20  ;;  %v983_v26 = vmul.f32 %v1834_v46, %v1834_v46  ;;  %s1195_s19 = sshll.u32 %s1777_s9, 1  ;;  %s1932_s29 = scalar_lea.hbm %s1983_s3, %s1732_s28 }
 0x127   : > { %s230_s23 = scalar_lea.vmem [#allocation5], %s1195_s19  ;;  %vm1022_vm1 = vcmask 1040384   ;;  %s1031_s30 = scalar_lea.sflag [#allocation6], %s1777_s9 }
 0x128   : > { %v1004_v2 = vadd.f32 %v1003_v0, %v973_v62  ;;  %v936_v3 = vadd.f32 %v935_v63, %v1808_v5  ;;  %s1062_s15 = sshll.u32 %s230_s23, 4  ;;  %s1652_s5 = smov [#allocation5]   ;;  %s1934_s15 = int_to_ptr.vmem [resolvable:$true] %s1062_s15 }
 0x129   : > { %s1565_s4 = scalar_lea.vmem %s1934_s15, 32  ;;  %s1569_s6 = sshll.u32 %s1652_s5, 4  ;;  %s1570_s6 = int_to_ptr.vmem [resolvable:$false] %s1569_s6 }
 0x12a   : > { %v937_v7 = vadd.f32 %v1800_v58, %v936_v3  ;;  %v1005_v8 = vadd.f32 %v1004_v2, %v974_v4  ;;  %v979_v58 = vmul.f32 %v1816_v18, %v1816_v18  ;;  %p1566_p2 = scmp.ne.s32.totalorder %s1934_s15, %s1565_s4  ;;  %s1571_s7 = scalar_lea.vmem %s1570_s6, 64 }
 0x12b   : > { %p1572_p6 = scmp.lt.s32.totalorder %s1934_s15, %s1570_s6  ;;  %p1573_p7 = scmp.lt.s32.totalorder %s1571_s7, %s1565_s4 }
 0x12c   : > { %v1006_v9 = vadd.f32 %v1005_v8, %v975_v6  ;;  %v938_v10 = vadd.f32 %v1804_v1, %v937_v7  ;;  %v980_v1 = vmul.f32 %v1820_v25, %v1820_v25  ;;  %p1567_p3 = pnand %p1566_p2, %p1713_p4 }
 0x12d   : > { %p1574_p9 = por %p1573_p7, %p1572_p6 }
 0x12e   : > { %v939_v11 = vadd.f32 %v938_v10, %v1818_v20  ;;  %v1007_v12 = vadd.f32 %v1006_v9, %v976_v41  ;;  %v981_v20 = vmul.f32 %v1838_v47, %v1838_v47  ;;  %p1568_p5 = pneg %p1567_p3 }
 0x130   : > { %v1008_v13 = vadd.f32 %v1007_v12, %v977_v60  ;;  %v940_v5 = vadd.f32 %v939_v11, %v1824_v29  ;;  %p1575_p10 = pnand %p1574_p9, %p1568_p5 }
 0x132   : > { %v941_v15 = vadd.f32 %v1816_v18, %v940_v5  ;;  %v1009_v16 = vadd.f32 %v1008_v13, %v978_v14  ;;  %v982_v18 = vmul.f32 %v1845_v52, %v1845_v52 }
 0x134   : > { %v1010_v17 = vadd.f32 %v1009_v16, %v979_v58  ;;  %v942_v19 = vadd.f32 %v1820_v25, %v941_v15  ;;  %v984_v25 = vmul.f32 %v1841_v50, %v1841_v50 }
 0x136   : > { %v943_v21 = vadd.f32 %v942_v19, %v1838_v47  ;;  %v1011_v22 = vadd.f32 %v1010_v17, %v980_v1 }
 0x138   : > { %v1012_v23 = vadd.f32 %v1011_v22, %v981_v20  ;;  %v944_v24 = vadd.f32 %v943_v21, %v1845_v52 }
 0x13a   : > { %v945_v27 = vadd.f32 %v1834_v46, %v944_v24  ;;  %v1013_v28 = vadd.f32 %v1012_v23, %v982_v18 }
 0x13c   : > { %v946_v29 = vadd.f32 %v1841_v50, %v945_v27  ;;  %v1014_v30 = vadd.f32 %v1013_v28, %v983_v26 }
 0x13e   : > { %v947_v31 = vrot.slane %v946_v29, 4  ;;  %v1015_v32 = vadd.f32 %v1014_v30, %v984_v25 }
 0x140   : > { %v948_v33 = vadd.f32 %v947_v31, %v946_v29  ;;  %v1016_v35 = vrot.slane %v1015_v32, 4 }
 0x142   : > { %v949_v37 = vrot.slane %v948_v33, 2  ;;  %v1017_v38 = vadd.f32 %v1016_v35, %v1015_v32 }
 0x144   : > { %v950_v39 = vadd.f32 %v949_v37, %v948_v33  ;;  %v1018_v40 = vrot.slane %v1017_v38, 2 }
 0x146   : > { %v951_v42 = vrot.slane %v950_v39, 1  ;;  %v1019_v43 = vadd.f32 %v1018_v40, %v1017_v38 }
 0x148   : > { %v1020_v44 = vrot.slane %v1019_v43, 1  ;;  %v952_v46 = vadd.f32 %v951_v42, %v950_v39 }
 0x14a   : > { %v1021_v47 = vadd.f32 %v1020_v44, %v1019_v43 }
 0x14c   : > { %v1023_v48 = vsel %vm1022_vm1, %v952_v46, %v1021_v47 }
 0x14d   : > { %1024 = vst [vmem:[%s230_s23] sm:$0x3] %v1023_v48 }
 0x14e   : > { %1578 = shalt.err (!%p1575_p10)
}
 0x14f   : > { %s1579_s28 = scalar_lea.hbm %s1932_s29, 32  ;;  %s1583_s10 = scalar_lea.hbm %s1983_s3, 64 }
 0x150   : > { %p1580_p11 = scmp.ne.s32.totalorder %s1932_s29, %s1579_s28  ;;  %p1584_p0 = scmp.lt.u32.totalorder %s1932_s29, %s1983_s3 }
 0x151   : > { %p1585_p1 = scmp.lt.u32.totalorder %s1583_s10, %s1579_s28  ;;  %p1587_p3 = scmp.lt.u32.totalorder %s1579_s28, %s1932_s29 }
 0x152   : > { %p1581_p12 = pnand %p1580_p11, %p1713_p4 }
 0x153   : > { %p1586_p2 = por %p1585_p1, %p1584_p0 }
 0x154   : > { %p1582_p13 = pneg %p1581_p12 }
 0x155   : > { %p1588_p5 = por %p1587_p3, %p1586_p2 }
 0x157   : > { %p1589_p6 = pnand %p1588_p5, %p1582_p13 }
 0x159   : > { %1592 = shalt.err (!%p1589_p6)
}
 0x15a   : > { %1458 = dma.vmem_to_hbm [thread:$0]  (%p1713_p4), %s1934_s15, 32, %s1932_s29, %s1031_s30  }
 0x15b PF: > { %p1468_p7 = scmp.ge.s32.totalorder %s1647_s17, 2  ;;  %s1074_s21 = sand.u32 1, %s1627_s12  }
 0x15c   : > { %s1075_s19 = scalar_lea.sflag [#allocation4], %s1074_s21 }
 0x15d   : > { %p1462_p9 = pnand %p1468_p7, %p1720_p8 }
 0x15f   : > { %1618 = dma.done.wait (!%p1462_p9), %s1075_s19, 2048  }
 0x160   : > { %1620 = vsyncadd (!%p1462_p9), %s1075_s19, 4294965248  ;;  %s1084_s23 = scalar_lea.sflag [#allocation6], %s1074_s21 }
 0x161   : > { %1622 = dma.done.wait (!%p1462_p9), %s1084_s23, 32  }
 0x162   : > { %1624 = vsyncadd (!%p1462_p9), %s1084_s23, 4294967264  ;;  %s20_s17 = sadd.s32 1, %s1647_s17   ;;  %s1986_s12 = smov %s1631_s13 }
 0x163   : > { %p17_p10 = scmp.ge.s32.totalorder %s20_s17, 4   ;;  %s1987_s13 = smov %s1635_s14 }
 0x164   : > { %s1988_s14 = smov %s1726_s25  ;;  %s1989_s15 = smov %s1643_s16 }
 0x165   : > { %s1990_s16 = smov %s1992_s20  ;;  %19 = sbr.rel (!%p17_p10) target bundleno = 6 (0x6), region = 91 }
 0x16c   :  { %1089 = vsyncpa [#allocation4], 1 }
 0x16d   :  { %1091 = vsyncpa [#allocation4 + $0x1], 1 }
 0x16e   :  { %1092 = vsyncpa [#allocation6], 1 }
 0x16f   :  { %1094 = vsyncpa [#allocation6 + $0x1], 1 }

</bundles_post_ra>
